<compile_context>
chip_gen: v5e
topology: v5e:2x2
jax: 0.10.0
libtpu: 0.0.40
codegen_flags: <defaults>
</compile_context>

<pallas_src>
import math
import functools

import jax
import jax.numpy as jnp
from jax import lax
from jax.experimental import pallas as pl
from jax.experimental.pallas import tpu as pltpu


def _round_up(x, m):
    return ((x + m - 1) // m) * m


def _cdiv(a, b):
    return (a + b - 1) // b


@functools.lru_cache(maxsize=1)
def _chip_defaults():
    """Generation-aware (tm, tn, tk, vmem_cap_bytes) defaults."""
    kind = ""
    try:
        kind = jax.devices()[0].device_kind.lower()
    except Exception:
        pass
    vmem_cap = None
    try:
        vmem_cap = int(pltpu.get_tpu_info().vmem_capacity_bytes)
    except Exception:
        vmem_cap = None

    if ("v5 lite" in kind) or ("v5lite" in kind) or ("v5e" in kind):
        # v5e: ridge ~240 flop/byte; larger tk amortizes the single vst slot.
        tm, tn, tk, cap = 512, 1024, 1024, 96 << 20
    elif ("v7" in kind) or ("7x" in kind) or (
            vmem_cap is not None and vmem_cap <= (80 << 20)):
        # v7x: 64 MiB VMEM per TC, ridge ~311 flop/byte -> smaller tiles,
        # tighter scoped-VMEM cap.
        tm, tn, tk, cap = 512, 1024, 512, 48 << 20
    else:
        # v6e (and other 128 MiB VMEM parts): go big to clear the HBM ridge.
        tm, tn, tk, cap = 1024, 2048, 512, 100 << 20

    if vmem_cap is not None:
        cap = min(cap, (vmem_cap * 3) // 4)
        if vmem_cap <= (40 << 20):          # very small-VMEM parts: stay modest
            tm, tn, tk = 256, 512, 512
    return int(tm), int(tn), int(tk), int(cap)


def _intermediate_kernel(x_ref, w_ref, b_ref, o_ref, acc_ref):
    # x_ref: (tm, tk)  w_ref: (tk, tn)  b_ref: (1, tn)  o_ref: (tm, tn)
    # acc_ref: (tm, tn) f32 accumulator, resident across the K grid axis.
    k = pl.program_id(2)

    @pl.when(k == 0)
    def _():
        acc_ref[...] = jnp.zeros_like(acc_ref)

    acc_ref[...] += jnp.dot(
        x_ref[...], w_ref[...], preferred_element_type=jnp.float32
    )

    @pl.when(k == pl.num_programs(2) - 1)
    def _():
        y = acc_ref[...] + b_ref[...].astype(jnp.float32)
        # Exact GELU (matches transformers.GELUActivation / F.gelu default):
        #   gelu(x) = 0.5 * x * (1 + erf(x / sqrt(2)))
        gelu = 0.5 * y * (1.0 + lax.erf(y * (1.0 / math.sqrt(2.0))))
        o_ref[...] = gelu.astype(o_ref.dtype)


@functools.partial(
    jax.jit,
    static_argnames=("tm", "tn", "tk", "compute_dtype", "out_dtype", "vmem_cap"))
def _imiter_intermediate_impl(hidden_states, weight_t, bias, *, tm, tn, tk,
                              compute_dtype, out_dtype, vmem_cap):
    B, S, H = hidden_states.shape
    Hw, I = weight_t.shape
    assert Hw == H, "weight must be pre-transposed to [hidden, intermediate]"
    M = B * S

    x2d = hidden_states.reshape(M, H)
    w = weight_t
    if compute_dtype is not None:
        if x2d.dtype != compute_dtype:
            x2d = x2d.astype(compute_dtype)
        if w.dtype != compute_dtype:
            w = w.astype(compute_dtype)   # no-op if weight stored in bf16
    b2d = bias.reshape(1, I)

    # Sub-32-bit operands pack along sublanes (bf16 native tile is 16x128):
    # round tm to 16 for packed dtypes, 8 for f32.
    m_align = 16 if jnp.dtype(x2d.dtype).itemsize < 4 else 8

    # Clamp tiles to the (alignment-rounded) problem, keeping (8,128) legality:
    #   tm: sublane axis of x/out; tn: lane axis of w/bias/out (lane-dense
    #   stores); tk: lane axis of x, sublane axis of w.
    tm = min(tm, _round_up(M, m_align))
    tn = min(tn, _round_up(I, 128))
    tk = min(tk, _round_up(H, 128))

    # Megacore balance (v7x has 2 TCs): if both parallel axes collapse to one
    # block but N could still be split, halve tn so both cores get work.
    if _cdiv(M, tm) == 1 and _cdiv(I, tn) == 1 and tn >= 256 and I > 128:
        tn = max(128, _round_up(_cdiv(tn, 2), 128))

    Mp = _round_up(M, tm)
    Ip = _round_up(I, tn)
    Hp = _round_up(H, tk)

    # Zero-pad to tile multiples (zeros contribute nothing to the matmul;
    # padded rows/cols of the output are trimmed afterwards).
    if (Mp, Hp) != (M, H):
        x2d = jnp.pad(x2d, ((0, Mp - M), (0, Hp - H)))
    if (Hp, Ip) != (H, I):
        w = jnp.pad(w, ((0, Hp - H), (0, Ip - I)))
    if Ip != I:
        b2d = jnp.pad(b2d, ((0, 0), (0, Ip - I)))

    grid = (Mp // tm, Ip // tn, Hp // tk)

    # VMEM budget: double-buffered x/w/out tiles + f32 accumulator + bias +
    # headroom.  Cap is generation-aware (no hard 48 MiB ceiling), but never
    # below what the chosen tiles actually need.
    x_bytes = jnp.dtype(x2d.dtype).itemsize
    w_bytes = jnp.dtype(w.dtype).itemsize
    o_bytes = jnp.dtype(out_dtype).itemsize
    b_bytes = jnp.dtype(b2d.dtype).itemsize
    vmem_need = (2 * tm * tk * x_bytes + 2 * tk * tn * w_bytes
                 + 2 * tm * tn * o_bytes + tm * tn * 4
                 + 2 * tn * b_bytes + (4 << 20))
    vmem_limit = min(max(vmem_need, 32 << 20), vmem_cap)
    vmem_limit = int(max(vmem_limit, vmem_need))

    cost = pl.CostEstimate(
        flops=2 * M * H * I,
        transcendentals=M * I,
        bytes_accessed=(M * H * x_bytes + H * I * w_bytes
                        + I * b_bytes + M * I * o_bytes),
    )

    out2d = pl.pallas_call(
        _intermediate_kernel,
        out_shape=jax.ShapeDtypeStruct((Mp, Ip), out_dtype),
        grid_spec=pltpu.PrefetchScalarGridSpec(
            num_scalar_prefetch=0,
            grid=grid,
            in_specs=[
                pl.BlockSpec((tm, tk), lambda i, j, k: (i, k)),  # activations
                pl.BlockSpec((tk, tn), lambda i, j, k: (k, j)),  # weight slab
                pl.BlockSpec((1, tn), lambda i, j, k: (0, j)),   # bias
            ],
            out_specs=pl.BlockSpec((tm, tn), lambda i, j, k: (i, j)),
            scratch_shapes=[pltpu.VMEM((tm, tn), jnp.float32)],
        ),
        compiler_params=pltpu.CompilerParams(
            dimension_semantics=("parallel", "parallel", "arbitrary"),
            vmem_limit_bytes=vmem_limit,
        ),
        cost_estimate=cost,
    )(x2d, w, b2d)

    return out2d[:M, :I].reshape(B, S, I)


def imiter_intermediate(hidden_states, weight_t, bias, *, tm=None, tn=None,
                        tk=None, compute_dtype=jnp.bfloat16, out_dtype=None):
    """hidden_states: [B, S, H], weight_t: [H, I], bias: [I] -> [B, S, I].

    compute_dtype: MXU operand dtype (default bf16; pass None to keep the
    inputs' dtype).  Accumulation and the GELU epilogue are always f32.
    out_dtype: output dtype (default: same as hidden_states; pass bf16 to
    halve writeback/VMEM if downstream tolerates it).
    """
    dm, dn, dk, vmem_cap = _chip_defaults()
    H = hidden_states.shape[-1]
    if tm is None:
        tm = dm
    if tn is None:
        tn = dn
    if tk is None:
        tk = dk
        if H >= 1024:
            # Larger tk halves the per-k accumulator RMW + grid-step overhead.
            tk = max(tk, 1024)
    if out_dtype is None:
        out_dtype = hidden_states.dtype
    return _imiter_intermediate_impl(
        hidden_states, weight_t, bias,
        tm=int(tm), tn=int(tn), tk=int(tk),
        compute_dtype=(None if compute_dtype is None else jnp.dtype(compute_dtype)),
        out_dtype=jnp.dtype(out_dtype),
        vmem_cap=int(vmem_cap),
    )


def _reference(hidden_states, weight_t, bias):
    y = jnp.einsum("bsh,hi->bsi", hidden_states.astype(jnp.float32),
                   weight_t.astype(jnp.float32)) + bias.astype(jnp.float32)
    return 0.5 * y * (1.0 + lax.erf(y / jnp.sqrt(2.0)))


if __name__ == "__main__":
    # Small config consistent with the module: hidden_size=32, intermediate_size=128.
    batch, seq, hidden, intermediate = 2, 8, 32, 128

    key = jax.random.PRNGKey(0)
    k_x, k_w, k_b = jax.random.split(key, 3)

    hidden_states = jax.random.normal(k_x, (batch, seq, hidden), dtype=jnp.float32)
    # "Linear" params (weight stored pre-transposed: [H, I]).
    weight_t = jax.random.normal(k_w, (hidden, intermediate), dtype=jnp.float32) * 0.02
    bias = jax.random.normal(k_b, (intermediate,), dtype=jnp.float32) * 0.02

    ref = _reference(hidden_states, weight_t, bias)

    # 1) f32-operand path: tight-tolerance check of the kernel math.
    out_f32 = jax.block_until_ready(
        imiter_intermediate(hidden_states, weight_t, bias, compute_dtype=None))
    assert out_f32.shape == (batch, seq, intermediate)
    assert jnp.allclose(out_f32, ref.astype(out_f32.dtype), atol=1e-5, rtol=1e-5), \
        "mismatch vs reference (f32 path)"

    # 2) Default perf path: bf16 MXU operands, weight stored persistently in
    #    bf16 (no per-call cast pass); f32 accumulation + epilogue.
    weight_bf16 = weight_t.astype(jnp.bfloat16)
    out_bf16 = jax.block_until_ready(
        imiter_intermediate(hidden_states, weight_bf16, bias))
    assert out_bf16.shape == (batch, seq, intermediate)
    assert jnp.allclose(out_bf16, ref.astype(out_bf16.dtype), atol=2e-2, rtol=2e-2), \
        "mismatch vs reference (bf16 default path)"

    # 3) Awkward-shape path (padding + K tiling) with explicit small tiles.
    hs2 = jax.random.normal(k_x, (3, 7, 96), dtype=jnp.float32)
    wt2 = jax.random.normal(k_w, (96, 200), dtype=jnp.float32) * 0.02
    b2 = jax.random.normal(k_b, (200,), dtype=jnp.float32) * 0.02
    out2 = jax.block_until_ready(
        imiter_intermediate(hs2, wt2, b2, tm=64, tn=128, tk=128))
    ref2 = _reference(hs2, wt2, b2)
    assert out2.shape == (3, 7, 200)
    assert jnp.allclose(out2, ref2.astype(out2.dtype), atol=2e-2, rtol=2e-2), \
        "mismatch vs reference (padded bf16 path)"

    print("KERNEL_OK")
</pallas_src>

<mosaic_0001>
module attributes {stable_mosaic.version = 11 : i64} {
  func.func @_intermediate_kernel(%arg0: i32, %arg1: i32, %arg2: i32, %arg3: memref<16x128xf32, #tpu.memory_space<vmem>>, %arg4: memref<128x128xf32, #tpu.memory_space<vmem>>, %arg5: memref<1x128xf32, #tpu.memory_space<vmem>>, %arg6: memref<16x128xf32, #tpu.memory_space<vmem>>, %arg7: memref<16x128xf32, #tpu.memory_space<vmem>>) attributes {dimension_semantics = [#tpu.dimension_semantics<parallel>, #tpu.dimension_semantics<parallel>, #tpu.dimension_semantics<arbitrary>], iteration_bounds = array<i64: 1, 1, 1>, scalar_prefetch = 0 : i64, scratch_operands = 1 : i64, tpu.core_type = #tpu.core_type<tc>, window_params = [{transform_indices = @transform_0, window_bounds = array<i64: 16, 128>}, {transform_indices = @transform_1, window_bounds = array<i64: 128, 128>}, {transform_indices = @transform_2, window_bounds = array<i64: 1, 128>}, {transform_indices = @transform_3, window_bounds = array<i64: 16, 128>}]} {
    %c0_i32 = arith.constant 0 : i32
    %0 = arith.cmpi eq, %arg2, %c0_i32 : i32
    %1 = arith.extui %0 : i1 to i32
    %c0_i32_0 = arith.constant 0 : i32
    %2 = arith.cmpi ne, %1, %c0_i32_0 : i32
    scf.if %2 {
      %cst_10 = arith.constant 0.000000e+00 : f32
      %12 = vector.broadcast %cst_10 : f32 to vector<16x128xf32>
      %c0_11 = arith.constant 0 : index
      %c0_12 = arith.constant 0 : index
      %13 = vector.load %arg7[%c0_11, %c0_12] : memref<16x128xf32, #tpu.memory_space<vmem>>, vector<16x128xf32>
      tpu.vector_store %arg7[%c0_11, %c0_12], %12 {strides = array<i32>} : memref<16x128xf32, #tpu.memory_space<vmem>>, vector<16x128xf32>,
    } else {
    }
    %c0 = arith.constant 0 : index
    %c0_1 = arith.constant 0 : index
    %3 = vector.load %arg7[%c0, %c0_1] : memref<16x128xf32, #tpu.memory_space<vmem>>, vector<16x128xf32>
    %c0_2 = arith.constant 0 : index
    %c0_3 = arith.constant 0 : index
    %4 = vector.load %arg3[%c0_2, %c0_3] : memref<16x128xf32, #tpu.memory_space<vmem>>, vector<16x128xf32>
    %c0_4 = arith.constant 0 : index
    %c0_5 = arith.constant 0 : index
    %5 = vector.load %arg4[%c0_4, %c0_5] : memref<128x128xf32, #tpu.memory_space<vmem>>, vector<128x128xf32>
    %cst = arith.constant dense<0.000000e+00> : vector<16x128xf32>
    %6 = tpu.matmul %4, %5, %cst {dimension_numbers = #tpu.dot_dimension_numbers<[1], [0], [0], [1], [0, 0, 1, 1], [], []>} : vector<16x128xf32>, vector<128x128xf32>, vector<16x128xf32> -> vector<16x128xf32>
    %7 = arith.addf %3, %6 : vector<16x128xf32>
    %c0_6 = arith.constant 0 : index
    %c0_7 = arith.constant 0 : index
    %8 = vector.load %arg7[%c0_6, %c0_7] : memref<16x128xf32, #tpu.memory_space<vmem>>, vector<16x128xf32>
    tpu.vector_store %arg7[%c0_6, %c0_7], %7 {strides = array<i32>} : memref<16x128xf32, #tpu.memory_space<vmem>>, vector<16x128xf32>,
    %c0_i32_8 = arith.constant 0 : i32
    %9 = arith.cmpi eq, %arg2, %c0_i32_8 : i32
    %10 = arith.extui %9 : i1 to i32
    %c0_i32_9 = arith.constant 0 : i32
    %11 = arith.cmpi ne, %10, %c0_i32_9 : i32
    scf.if %11 {
      %c0_10 = arith.constant 0 : index
      %c0_11 = arith.constant 0 : index
      %12 = vector.load %arg7[%c0_10, %c0_11] : memref<16x128xf32, #tpu.memory_space<vmem>>, vector<16x128xf32>
      %c0_12 = arith.constant 0 : index
      %c0_13 = arith.constant 0 : index
      %13 = vector.load %arg5[%c0_12, %c0_13] : memref<1x128xf32, #tpu.memory_space<vmem>>, vector<1x128xf32>
      %14 = vector.broadcast %13 : vector<1x128xf32> to vector<16x128xf32>
      %15 = arith.addf %12, %14 : vector<16x128xf32>
      %cst_14 = arith.constant 5.000000e-01 : f32
      %16 = vector.broadcast %cst_14 : f32 to vector<16x128xf32>
      %17 = arith.mulf %16, %15 : vector<16x128xf32>
      %cst_15 = arith.constant 0.707106769 : f32
      %18 = vector.broadcast %cst_15 : f32 to vector<16x128xf32>
      %19 = arith.mulf %15, %18 : vector<16x128xf32>
      %20 = math.erf %19 : vector<16x128xf32>
      %cst_16 = arith.constant 1.000000e+00 : f32
      %21 = vector.broadcast %cst_16 : f32 to vector<16x128xf32>
      %22 = arith.addf %21, %20 : vector<16x128xf32>
      %23 = arith.mulf %17, %22 : vector<16x128xf32>
      %c0_17 = arith.constant 0 : index
      %c0_18 = arith.constant 0 : index
      %24 = vector.load %arg6[%c0_17, %c0_18] : memref<16x128xf32, #tpu.memory_space<vmem>>, vector<16x128xf32>
      tpu.vector_store %arg6[%c0_17, %c0_18], %23 {strides = array<i32>} : memref<16x128xf32, #tpu.memory_space<vmem>>, vector<16x128xf32>,
    } else {
    }
    return
  }
  func.func @transform_0(%arg0: i32, %arg1: i32, %arg2: i32) -> (i32, i32) {
    %c0_i32 = arith.constant 0 : i32
    return %arg0, %arg2 : i32, i32
  }
  func.func @transform_1(%arg0: i32, %arg1: i32, %arg2: i32) -> (i32, i32) {
    %c0_i32 = arith.constant 0 : i32
    return %arg2, %arg1 : i32, i32
  }
  func.func @transform_2(%arg0: i32, %arg1: i32, %arg2: i32) -> (i32, i32) {
    %c0_i32 = arith.constant 0 : i32
    %c0_i32_0 = arith.constant 0 : i32
    return %c0_i32, %arg1 : i32, i32
  }
  func.func @transform_3(%arg0: i32, %arg1: i32, %arg2: i32) -> (i32, i32) {
    %c0_i32 = arith.constant 0 : i32
    return %arg0, %arg1 : i32, i32
  }
}

</mosaic_0001>

<bundles_post_ra>
// kernel: _imiter_intermediate_impl.1
= control target key start
LH: loop header
LB: loop body
LE: loop exit
PB: predicated region body
PF: predicated region fallthrough
CT: control target
= control target key end

     0   :  { %s340_s0 = inlined_call_operand.vmem [shape: f32[16,128], index: 0, kind: input, shape index: {}]   ;;  %s341_s1 = inlined_call_operand.vmem [shape: f32[128,128], index: 1, kind: input, shape index: {}]   ;;  %s342_s2 = inlined_call_operand.vmem [shape: f32[1,128], index: 2, kind: input, shape index: {}]   ;;  %s343_s3 = inlined_call_operand.hbm [shape: f32[16,128], index: 3, kind: output, shape index: {}]  }
   0x1   :  { %v40_v0 = vld [vmem:[%s341_s1 + $0x78] sm:$0xff]  ;;  %v39_v1 = vld [vmem:[%s341_s1 + $0x70] sm:$0xff]  ;;  %v38_v2 = vld [vmem:[%s341_s1 + $0x68] sm:$0xff] }
   0x2   :  { %41 = vmatpush.msra.mxu0 %v40_v0  ;;  %189 = vmatpush.msra.mxu1 %v40_v0  ;;  %v37_v3 = vld [vmem:[%s341_s1 + $0x60] sm:$0xff]  ;;  %v36_v4 = vld [vmem:[%s341_s1 + $0x58] sm:$0xff] }
   0x4   :  { %42 = vmatpush.msra.mxu0 %v39_v1  ;;  %190 = vmatpush.msra.mxu1 %v39_v1 }
   0x6   :  { %43 = vmatpush.msra.mxu0 %v38_v2  ;;  %191 = vmatpush.msra.mxu1 %v38_v2 }
   0x7   :  { %8 = vsyncpa [#allocation4], 0  ;;  %v35_v5 = vld [vmem:[%s341_s1 + $0x50] sm:$0xff]  ;;  %v34_v6 = vld [vmem:[%s341_s1 + $0x48] sm:$0xff]  ;;  %s175_s24 = sshll.u32 %s343_s3, 4  ;;  %s240_s25 = smov 128   ;;  %s176_s24 = int_to_ptr.hbm [resolvable:$true] %s175_s24 }
   0x8   :  { %44 = vmatpush.msra.mxu0 %v37_v3  ;;  %192 = vmatpush.msra.mxu1 %v37_v3  ;;  %v33_v7 = vld [vmem:[%s341_s1 + $0x40] sm:$0xff]  ;;  %v32_v8 = vld [vmem:[%s341_s1 + $0x38] sm:$0xff]  ;;  %v31_v9 = vld [vmem:[%s341_s1 + $0x30] sm:$0xff]  ;;  %s241_s26 = smov 8  }
   0x9   :  { %v30_v10 = vld [vmem:[%s341_s1 + $0x28] sm:$0xff]  ;;  %v29_v11 = vld [vmem:[%s341_s1 + $0x20] sm:$0xff]  ;;  %v28_v12 = vld [vmem:[%s341_s1 + $0x18] sm:$0xff] }
   0xa   :  { %45 = vmatpush.msra.mxu0 %v36_v4  ;;  %193 = vmatpush.msra.mxu1 %v36_v4  ;;  %v27_v13 = vld [vmem:[%s341_s1 + $0x10] sm:$0xff]  ;;  %v26_v14 = vld [vmem:[%s341_s1 + $0x8] sm:$0xff]  ;;  %v25_v15 = vld [vmem:[%s341_s1] sm:$0xff] }
   0xb   :  { %v23_v16 = vld [vmem:[%s340_s0] sm:$0xff]  ;;  %v24_v17 = vld [vmem:[%s340_s0 + $0x8] sm:$0xff]  ;;  %s239_s0 = smov [#allocation3]  }
   0xc   :  { %46 = vmatpush.msra.mxu0 %v35_v5  ;;  %194 = vmatpush.msra.mxu1 %v35_v5  ;;  %v208_v18 = vld [vmem:[%s342_s2] ss:$0 sm:$0xff]  ;;  %s173_s1 = sshll.u32 %s239_s0, 4  ;;  %s174_s1 = int_to_ptr.vmem [resolvable:$true] %s173_s1 }
   0xe   :  { %47 = vmatpush.msra.mxu0 %v34_v6  ;;  %195 = vmatpush.msra.mxu1 %v34_v6 }
  0x10   :  { %48 = vmatpush.msra.mxu0 %v33_v7  ;;  %196 = vmatpush.msra.mxu1 %v33_v7 }
  0x12   :  { %49 = vmatpush.msra.mxu0 %v32_v8  ;;  %197 = vmatpush.msra.mxu1 %v32_v8 }
  0x14   :  { %50 = vmatpush.msra.mxu0 %v31_v9  ;;  %198 = vmatpush.msra.mxu1 %v31_v9 }
  0x16   :  { %51 = vmatpush.msra.mxu0 %v30_v10  ;;  %199 = vmatpush.msra.mxu1 %v30_v10 }
  0x18   :  { %52 = vmatpush.msra.mxu0 %v29_v11  ;;  %200 = vmatpush.msra.mxu1 %v29_v11 }
  0x1a   :  { %53 = vmatpush.msra.mxu0 %v28_v12  ;;  %201 = vmatpush.msra.mxu1 %v28_v12 }
  0x1c   :  { %54 = vmatpush.msra.mxu0 %v27_v13  ;;  %202 = vmatpush.msra.mxu1 %v27_v13 }
  0x1e   :  { %55 = vmatpush.msra.mxu0 %v26_v14  ;;  %203 = vmatpush.msra.mxu1 %v26_v14 }
  0x20   :  { %56 = vmatpush.msra.mxu0 %v25_v15  ;;  %204 = vmatpush.msra.mxu1 %v25_v15 }
  0x21   :  { %57 = vmatmul.f32.vlgmr.msra.gmra.mxu0 %v23_v16  ;;  %60 = vmatmul.f32.vlgmr.msra.gmra.mxu1 %v24_v17 }
  0x9e   :  { %v58_v19 = vpop.f32.mrf.mxu0  ;;  %v61_v20 = vpop.f32.mrf.mxu1 }
  0x9f   :  { %v319_v21 = vadd.f32 %v208_v18, %v58_v19  ;;  %v321_v22 = vadd.f32 %v208_v18, %v61_v20 }
  0xa1   :  { %v324_v23 = vmul.f32 0.70710677, %v319_v21  ;;  %v327_v24 = vmul.f32 0.70710677, %v321_v22 }
  0xa3   :  { %v83_v25 = vmul.f32 %v324_v23, %v324_v23  ;;  %v123_v26 = vmul.f32 %v327_v24, %v327_v24 }
  0xa5   :  { %v84_v27 = vmin.f32 %v83_v25, 16.0  ;;  %v124_v28 = vmin.f32 %v123_v26, 16.0 }
  0xa7   :  { %v85_v29 = vmul.f32 2.1237322e-06, %v84_v27  ;;  %v96_v30 = vmul.f32 3.8918573e-05, %v84_v27  ;;  %v125_v31 = vmul.f32 2.1237322e-06, %v124_v28 }
  0xa8   :  { %v136_v32 = vmul.f32 3.8918573e-05, %v124_v28 }
  0xa9   :  { %v86_v33 = vadd.f32 0.00028619796, %v85_v29  ;;  %v97_v34 = vadd.f32 0.001143296, %v96_v30  ;;  %v126_v35 = vadd.f32 0.00028619796, %v125_v31 }
  0xaa   :  { %v137_v36 = vadd.f32 0.001143296, %v136_v32 }
  0xab   :  { %v87_v37 = vmul.f32 %v86_v33, %v84_v27  ;;  %v98_v38 = vmul.f32 %v97_v34, %v84_v27  ;;  %v127_v39 = vmul.f32 %v126_v35, %v124_v28 }
  0xac   :  { %v138_v40 = vmul.f32 %v137_v36, %v124_v28  ;;  %v80_v36 = vmul.f32 0.5, %v321_v22 }
  0xad   :  { %v88_v41 = vadd.f32 0.0036580483, %v87_v37  ;;  %v99_v42 = vadd.f32 0.014752088, %v98_v38  ;;  %v128_v45 = vadd.f32 0.0036580483, %v127_v39 }
  0xae   :  { %v139_v43 = vadd.f32 0.014752088, %v138_v40 }
  0xaf   :  { %v100_v44 = vmul.f32 %v99_v42, %v84_v27  ;;  %v89_v47 = vmul.f32 %v88_v41, %v84_v27  ;;  %v129_v51 = vmul.f32 %v128_v45, %v124_v28 }
  0xb0   :  { %v140_v46 = vmul.f32 %v139_v43, %v124_v28 }
  0xb1   :  { %v101_v48 = vadd.f32 0.112945676, %v100_v44  ;;  %v90_v53 = vadd.f32 0.05243302, %v89_v47  ;;  %v130_v57 = vadd.f32 0.05243302, %v129_v51 }
  0xb2   :  { %v141_v49 = vadd.f32 0.112945676, %v140_v46 }
  0xb3   :  { %v102_v50 = vmul.f32 %v101_v48, %v84_v27  ;;  %v91_v59 = vmul.f32 %v90_v53, %v84_v27  ;;  %v131_v62 = vmul.f32 %v130_v57, %v124_v28 }
  0xb4   :  { %v142_v52 = vmul.f32 %v141_v49, %v124_v28 }
  0xb5   :  { %v103_v54 = vadd.f32 0.4994258, %v102_v50  ;;  %v92_v63 = vadd.f32 0.18741608, %v91_v59  ;;  %v132_v0 = vadd.f32 0.18741608, %v131_v62 }
  0xb6   :  { %v143_v55 = vadd.f32 0.4994258, %v142_v52 }
  0xb7   :  { %v104_v56 = vmul.f32 %v103_v54, %v84_v27  ;;  %v93_v2 = vmul.f32 %v92_v63, %v84_v27  ;;  %v133_v5 = vmul.f32 %v132_v0, %v124_v28 }
  0xb8   :  { %v144_v58 = vmul.f32 %v143_v55, %v124_v28 }
  0xb9   :  { %v105_v60 = vadd.f32 1.0, %v104_v56  ;;  %v94_v8 = vadd.f32 1.1283791, %v93_v2  ;;  %v134_v14 = vadd.f32 1.1283791, %v133_v5 }
  0xba   :  { %v145_v61 = vadd.f32 1.0, %v144_v58 }
  0xbb   :  { %209 = vrcp.f32 %v105_v60  ;;  %v117_v9 = vand.u32 2147483648, %v105_v60  ;;  %v115_v12 = vand.u32 2147483647, %v105_v60  ;;  %vm111_vm2 = vweird.f32 %v105_v60 }
  0xbc   :  { %211 = vrcp.f32 %v145_v61  ;;  %v157_v13 = vand.u32 2147483648, %v145_v61  ;;  %v155_v16 = vand.u32 2147483647, %v145_v61  ;;  %vm151_vm4 = vweird.f32 %v145_v61 }
  0xbd   :  { %v118_v18 = vor.u32 1.1754944e-38, %v117_v9  ;;  %v95_v20 = vmul.f32 %v94_v8, %v324_v23  ;;  %vm116_vm5 = vcmp.eq.f32.partialorder %v115_v12, 8.507059e+37  ;;  %v135_v28 = vmul.f32 %v134_v14, %v327_v24 }
  0xbe   :  { %v158_v26 = vor.u32 1.1754944e-38, %v157_v13  ;;  %vm156_vm7 = vcmp.eq.f32.partialorder %v155_v16, 8.507059e+37  ;;  %v79_v23 = vmul.f32 0.5, %v319_v21 }
  0xc1   :  { %v210_v1 = vpop.eup %209 }
  0xc2   :  { %v212_v3 = vpop.eup %211  ;;  %v107_v4 = vmul.f32 %v210_v1, %v105_v60  ;;  %vm112_vm0 = vweird.f32 %v210_v1 }
  0xc3   :  { %v147_v6 = vmul.f32 %v212_v3, %v145_v61  ;;  %vm152_vm1 = vweird.f32 %v212_v3  ;;  %vm113_vm3 = vmor %vm111_vm2, %vm112_vm0 }
  0xc4   :  { %v108_v7 = vsub.f32 1.0, %v107_v4  ;;  %vm153_vm6 = vmor %vm151_vm4, %vm152_vm1 }
  0xc5   :  { %v148_v10 = vsub.f32 1.0, %v147_v6 }
  0xc6   :  { %v109_v11 = vmul.f32 %v210_v1, %v108_v7 }
  0xc7   :  { %v149_v15 = vmul.f32 %v212_v3, %v148_v10 }
  0xc8   :  { %v110_v17 = vadd.f32 %v210_v1, %v109_v11 }
  0xc9   :  { %v150_v19 = vadd.f32 %v212_v3, %v149_v15 }
  0xca   :  { %v114_v25 = vsel %vm113_vm3, %v210_v1, %v110_v17 }
  0xcb   :  { %v119_v27 = vsel %vm116_vm5, %v118_v18, %v114_v25  ;;  %v154_v29 = vsel %vm153_vm6, %v212_v3, %v150_v19 }
  0xcc   :  { %v120_v30 = vmul.f32 %v119_v27, %v95_v20  ;;  %v159_v31 = vsel %vm156_vm7, %v158_v26, %v154_v29 }
  0xcd   :  { %v160_v32 = vmul.f32 %v159_v31, %v135_v28 }
  0xce   :  { %v187_v33 = vclamps-f32 %v120_v30, 1.0 }
  0xcf   :  { %v188_v34 = vclamps-f32 %v160_v32, 1.0 }
  0xd0   :  { %v163_v35 = vadd.f32 1.0, %v187_v33 }
  0xd1   :  { %v164_v37 = vadd.f32 1.0, %v188_v34 }
  0xd2   :  { %v165_v24 = vmul.f32 %v163_v35, %v79_v23 }
  0xd3   :  { %v166_v38 = vmul.f32 %v164_v37, %v80_v36 }
  0xd4   :  { %167 = vst [vmem:[#allocation3] sm:$0xff] %v165_v24 }
  0xd5   :  { %168 = vst [vmem:[#allocation3 + $0x8] sm:$0xff] %v166_v38 }
  0xd6   :  { %181 = dma.vmem_to_hbm [thread:$0]  %s174_s1, 256, %s176_s24, [#allocation4], %s240_s25, %s240_s25, %s241_s26  }
  0xd7   :  { %237 = dma.done.wait [#allocation4], 256  }
  0xd8   :  { %238 = vsyncadd [#allocation4], 4294967040 }
  0xd9   :  { %186 = vsyncpa [#allocation4], 1 }

</bundles_post_ra>
